<compile_context>
chip_gen: v7x
topology: tpu7x:2x2x1
jax: 0.10.0
libtpu: 0.0.40
codegen_flags: <defaults>
</compile_context>

<pallas_src>
import functools
import numpy as np
import jax
import jax.numpy as jnp
from jax.experimental import pallas as pl
from jax.experimental.pallas import tpu as pltpu


# ----------------------------- kernel helpers ------------------------------

def _softmax(x):
    m = jnp.max(x, axis=-1, keepdims=True)
    e = jnp.exp(x - m)
    s = jnp.sum(e, axis=-1, keepdims=True)
    # exact reciprocal (approx=True would risk the 1e-5 test tolerance);
    # one divide on the [.., 1] denom + broadcast multiply instead of a
    # full-width tensor divide.
    return e * pl.reciprocal(s, approx=False)


def _log_softmax(x):
    m = jnp.max(x, axis=-1, keepdims=True)
    s = x - m
    return s - jnp.log(jnp.sum(jnp.exp(s), axis=-1, keepdims=True))


# ------------------------------ cls loss kernel ----------------------------
# grid = (chunk_num,), single pass. Accumulate in VMEM scratch:
#   sum_t[b,:]  = sum_q softmax((T_q - center)/temp)[b,:]
#   sum_ls[b,:] = sum_v log_softmax(S_v / student_temp)[b,:]
#   diag[b]     = sum_q <t_q[b], ls_q[b]>
# then  cls_sum = (1/B) * ( sum_b diag[b] - sum_b <sum_t[b], sum_ls[b]> )
#             == sum_{q != v} mean_b sum_d ( -t_q * ls_v )

def _cls_loss_kernel(t_ref, s_ref, c_ref, o_ref, sum_t, sum_ls, diag,
                     *, inv_temp, inv_stemp, inv_b):
    q = pl.program_id(0)
    nq = pl.num_programs(0)

    @pl.when(q == 0)
    def _():
        sum_t[...] = jnp.zeros_like(sum_t)
        sum_ls[...] = jnp.zeros_like(sum_ls)
        diag[...] = jnp.zeros_like(diag)

    t = _softmax((t_ref[...] - c_ref[...]) * inv_temp)       # [B, D]
    ls = _log_softmax(s_ref[...] * inv_stemp)                # [B, D]
    sum_t[...] += t
    sum_ls[...] += ls
    diag[...] += jnp.sum(t * ls, axis=-1, keepdims=True)     # [B, 1]

    @pl.when(q == nq - 1)
    def _():
        cross = jnp.sum(sum_t[...] * sum_ls[...])            # scalar
        o_ref[0] = (jnp.sum(diag[...]) - cross) * inv_b


def _cls_loss_sum(teacher_cls, student_cls, center, *, chunk_num, temp, student_temp):
    N, D = teacher_cls.shape
    B = N // chunk_num
    kernel = functools.partial(
        _cls_loss_kernel,
        inv_temp=float(1.0 / temp),
        inv_stemp=float(1.0 / student_temp),
        inv_b=float(1.0 / B))
    out = pl.pallas_call(
        kernel,
        out_shape=jax.ShapeDtypeStruct((1,), jnp.float32),
        grid_spec=pltpu.PrefetchScalarGridSpec(
            num_scalar_prefetch=0,
            grid=(chunk_num,),
            in_specs=[
                pl.BlockSpec((B, D), lambda q: (q, 0)),   # teacher chunk q
                pl.BlockSpec((B, D), lambda q: (q, 0)),   # student chunk q
                pl.BlockSpec((1, D), lambda q: (0, 0)),   # center (broadcast)
            ],
            out_specs=pl.BlockSpec(memory_space=pltpu.MemorySpace.SMEM),
            scratch_shapes=[
                pltpu.VMEM((B, D), jnp.float32),          # sum_t
                pltpu.VMEM((B, D), jnp.float32),          # sum_ls
                pltpu.VMEM((B, 1), jnp.float32),          # diag
            ],
        ),
        compiler_params=pltpu.CompilerParams(
            dimension_semantics=("arbitrary",),
            vmem_limit_bytes=48 * 1024 * 1024),
    )(teacher_cls, student_cls, center)
    return out[0]


# ----------------------------- patch loss kernel ---------------------------
# grid = (chunk_num, P // Pt). For chunk q:
#   num_acc[b] = sum_p mask[b,p] * sum_d -softmax((Tp_q-center2)/temp2)*log_softmax(Sp_q/stemp)
# accumulated over P tiles; finalized (divide by clamped mask count, batch mean)
# on the last P tile into per-chunk partial o_ref[q].

def _choose_p_tile(P, B, D, budget_bytes):
    """Largest Pt with P % Pt == 0 and (Pt % 8 == 0 or Pt == P) whose block fits budget."""
    cands = [p for p in range(P, 0, -1) if P % p == 0 and (p % 8 == 0 or p == P)]
    for p in cands:
        if B * p * D * 4 <= budget_bytes:
            return p
    return cands[-1]   # nothing fits -> smallest legal tile


def _patch_loss_kernel(t_ref, s_ref, c_ref, m_ref, o_ref, num_acc,
                       *, inv_temp2, inv_stemp, inv_b, p_tile):
    q = pl.program_id(0)
    pi = pl.program_id(1)
    npi = pl.num_programs(1)

    @pl.when(pi == 0)
    def _():
        num_acc[...] = jnp.zeros_like(num_acc)

    t = _softmax((t_ref[...] - c_ref[...]) * inv_temp2)      # [B, Pt, Dp]
    ls = _log_softmax(s_ref[...] * inv_stemp)                # [B, Pt, Dp]
    tls = jnp.sum(t * ls, axis=-1)                           # [B, Pt]  (= -loss2)
    start = pl.multiple_of(pi * p_tile, p_tile)
    m = m_ref[:, pl.ds(start, p_tile)]                       # [B, Pt] f32
    num_acc[...] += jnp.sum(tls * m, axis=-1, keepdims=True)  # [B, 1]

    @pl.when(pi == npi - 1)
    def _():
        den = jnp.maximum(jnp.sum(m_ref[...], axis=-1, keepdims=True), 1.0)   # [B, 1]
        o_ref[q] = -jnp.sum(num_acc[...] * pl.reciprocal(den, approx=False)) * inv_b


def _patch_loss_sum(teacher_patch, student_patch, center2, mask_flat, *,
                    chunk_num, temp2, student_temp,
                    block_budget_bytes=8 * 1024 * 1024):
    N, P, D = teacher_patch.shape
    B = N // chunk_num
    p_tile = _choose_p_tile(P, B, D, block_budget_bytes)
    n_p = P // p_tile
    kernel = functools.partial(
        _patch_loss_kernel,
        inv_temp2=float(1.0 / temp2),
        inv_stemp=float(1.0 / student_temp),
        inv_b=float(1.0 / B),
        p_tile=p_tile)
    out = pl.pallas_call(
        kernel,
        out_shape=jax.ShapeDtypeStruct((chunk_num,), jnp.float32),
        grid_spec=pltpu.PrefetchScalarGridSpec(
            num_scalar_prefetch=0,
            grid=(chunk_num, n_p),
            in_specs=[
                pl.BlockSpec((B, p_tile, D), lambda q, pi: (q, pi, 0)),  # teacher tile
                pl.BlockSpec((B, p_tile, D), lambda q, pi: (q, pi, 0)),  # student tile
                pl.BlockSpec((1, 1, D), lambda q, pi: (0, 0, 0)),        # center2
                pl.BlockSpec((B, P), lambda q, pi: (q, 0)),              # full-P mask chunk
            ],
            out_specs=pl.BlockSpec(memory_space=pltpu.MemorySpace.SMEM),
            scratch_shapes=[pltpu.VMEM((B, 1), jnp.float32)],            # num_acc
        ),
        compiler_params=pltpu.CompilerParams(
            # TODO(synk): v7x megacore — make q "parallel" with per-block VMEM partials.
            dimension_semantics=("arbitrary", "arbitrary"),
            vmem_limit_bytes=48 * 1024 * 1024),
    )(teacher_patch, student_patch, center2, mask_flat)
    return jnp.sum(out)


# ------------------------------- module port --------------------------------

class ClsPatchLossPallas:
    def __init__(self, out_dim, patch_out_dim, ngcrops, nlcrops,
                 warmup_teacher_temp, teacher_temp,
                 warmup_teacher_temp2, teacher_temp2,
                 warmup_teacher_temp_epochs, nepochs,
                 student_temp=0.1, center_momentum=0.9, center_momentum2=0.9,
                 lambda1=1.0, lambda2=1.0, mim_start_epoch=0):
        self.student_temp = student_temp
        self.center_momentum = center_momentum
        self.center_momentum2 = center_momentum2
        self.ngcrops = ngcrops
        self.nlcrops = nlcrops
        self.ncrops = ngcrops + nlcrops
        self.lambda1 = lambda1
        self.lambda2 = lambda2
        # VMEM budget (bytes) per pipelined patch-input block; 2 inputs x 2 buffers
        # x 8 MiB + mask + scratch stays well under the 48 MiB scoped limit.
        self.patch_block_budget_bytes = 8 * 1024 * 1024
        # deterministic buffer init (matches torch.zeros in __init__)
        self.center = jnp.zeros((1, out_dim), jnp.float32)
        self.center2 = jnp.zeros((1, 1, patch_out_dim), jnp.float32)
        self.teacher_temp_schedule = np.concatenate((
            np.linspace(warmup_teacher_temp, teacher_temp, warmup_teacher_temp_epochs),
            np.ones(nepochs - warmup_teacher_temp_epochs) * teacher_temp))
        if mim_start_epoch == 0:
            self.teacher_temp2_schedule = np.concatenate((
                np.linspace(warmup_teacher_temp2, teacher_temp2, warmup_teacher_temp_epochs),
                np.ones(nepochs - warmup_teacher_temp_epochs) * teacher_temp2))
        else:
            self.teacher_temp2_schedule = np.concatenate((
                np.ones(mim_start_epoch) * warmup_teacher_temp2,
                np.linspace(warmup_teacher_temp2, teacher_temp2, warmup_teacher_temp_epochs),
                np.ones(nepochs - warmup_teacher_temp_epochs - mim_start_epoch) * teacher_temp2))

    def __call__(self, student_output, teacher_output, student_mask, epoch, chunk_num):
        student_cls, student_patch = student_output
        teacher_cls, teacher_patch = teacher_output

        temp = float(self.teacher_temp_schedule[epoch])
        temp2 = float(self.teacher_temp2_schedule[epoch])

        # mask.flatten(-3, -1): [N, 1, Hp, Wp] -> [N, P]; .cuda()/.detach() are no-ops here
        mask_flat = student_mask.reshape(student_mask.shape[0], -1).astype(jnp.float32)

        cls_sum = _cls_loss_sum(teacher_cls, student_cls, self.center,
                                chunk_num=chunk_num, temp=temp,
                                student_temp=self.student_temp)
        patch_sum = _patch_loss_sum(teacher_patch, student_patch, self.center2, mask_flat,
                                    chunk_num=chunk_num, temp2=temp2,
                                    student_temp=self.student_temp,
                                    block_budget_bytes=self.patch_block_budget_bytes)

        n_loss_terms1 = chunk_num * (chunk_num - 1)
        n_loss_terms2 = chunk_num
        total_loss1 = cls_sum / n_loss_terms1 * self.lambda1
        total_loss2 = patch_sum / n_loss_terms2 * self.lambda2

        self.update_center(teacher_cls, teacher_patch)
        return total_loss2, total_loss1

    def update_center(self, teacher_cls, teacher_patch):
        # EMA buffer update: cheap reductions, kept as plain-JAX glue.
        # TODO(synk): under jax.jit this Python-state mutation would freeze; fine eagerly.
        cls_center = jnp.sum(teacher_cls, axis=0, keepdims=True) / teacher_cls.shape[0]
        self.center = self.center * self.center_momentum + cls_center * (1 - self.center_momentum)
        patch_center = jnp.sum(jnp.mean(teacher_patch, axis=1), axis=0, keepdims=True) / teacher_patch.shape[0]
        self.center2 = self.center2 * self.center_momentum2 + patch_center * (1 - self.center_momentum2)


# ------------------------------- pure-JAX reference -------------------------

def _reference_forward(student_cls, student_patch, teacher_cls, teacher_patch,
                       student_mask, center, center2, temp, temp2,
                       student_temp, lambda1, lambda2, chunk_num):
    sc = student_cls / student_temp
    sp = student_patch / student_temp
    tc = jax.nn.softmax((teacher_cls - center) / temp, axis=-1)
    tp = jax.nn.softmax((teacher_patch - center2) / temp2, axis=-1)
    mask = student_mask.reshape(student_mask.shape[0], -1).astype(jnp.float32)
    sc_c = jnp.split(sc, chunk_num, axis=0)
    sp_c = jnp.split(sp, chunk_num, axis=0)
    tc_c = jnp.split(tc, chunk_num, axis=0)
    tp_c = jnp.split(tp, chunk_num, axis=0)
    m_c = jnp.split(mask, chunk_num, axis=0)
    l1 = 0.0; n1 = 0; l2 = 0.0; n2 = 0
    for q in range(chunk_num):
        for v in range(chunk_num):
            if v == q:
                loss2 = jnp.sum(-tp_c[q] * jax.nn.log_softmax(sp_c[v], axis=-1), axis=-1)
                m = m_c[q]
                loss2 = jnp.sum(loss2 * m, axis=-1) / jnp.maximum(jnp.sum(m, axis=-1), 1.0)
                l2 = l2 + jnp.mean(loss2); n2 += 1
            else:
                loss1 = jnp.sum(-tc_c[q] * jax.nn.log_softmax(sc_c[v], axis=-1), axis=-1)
                l1 = l1 + jnp.mean(loss1); n1 += 1
    return l2 / n2 * lambda2, l1 / n1 * lambda1


# ------------------------------------ main ----------------------------------

if __name__ == "__main__":
    key = jax.random.PRNGKey(0)
    chunk_num = 2
    B = 8                 # samples per chunk
    N = chunk_num * B     # total "crops x batch" rows
    out_dim = 32
    patch_out_dim = 32
    Hp = Wp = 4
    P = Hp * Wp

    k1, k2, k3, k4, k5 = jax.random.split(key, 5)
    student_cls = jax.random.normal(k1, (N, out_dim), jnp.float32)
    teacher_cls = jax.random.normal(k2, (N, out_dim), jnp.float32)
    student_patch = jax.random.normal(k3, (N, P, patch_out_dim), jnp.float32)
    teacher_patch = jax.random.normal(k4, (N, P, patch_out_dim), jnp.float32)
    student_mask = jax.random.bernoulli(k5, 0.4, (N, 1, Hp, Wp))

    loss_mod = ClsPatchLossPallas(
        out_dim=out_dim, patch_out_dim=patch_out_dim, ngcrops=2, nlcrops=0,
        warmup_teacher_temp=0.04, teacher_temp=0.07,
        warmup_teacher_temp2=0.04, teacher_temp2=0.07,
        warmup_teacher_temp_epochs=5, nepochs=20,
        student_temp=0.1, lambda1=1.0, lambda2=1.0)
    # Force the P-tiling path (Pt=8 -> two P tiles) even at these tiny shapes so
    # the pipelined/accumulator code path is exercised and validated.
    loss_mod.patch_block_budget_bytes = B * 8 * patch_out_dim * 4

    epoch = 3
    center0, center20 = loss_mod.center, loss_mod.center2

    total_loss2, total_loss1 = loss_mod(
        (student_cls, student_patch), (teacher_cls, teacher_patch),
        student_mask, epoch, chunk_num)
    total_loss2, total_loss1 = jax.block_until_ready((total_loss2, total_loss1))

    ref2, ref1 = _reference_forward(
        student_cls, student_patch, teacher_cls, teacher_patch, student_mask,
        center0, center20,
        float(loss_mod.teacher_temp_schedule[epoch]),
        float(loss_mod.teacher_temp2_schedule[epoch]),
        loss_mod.student_temp, loss_mod.lambda1, loss_mod.lambda2, chunk_num)
    ref2, ref1 = jax.block_until_ready((ref2, ref1))

    np.testing.assert_allclose(np.asarray(total_loss1), np.asarray(ref1), rtol=1e-5, atol=1e-5)
    np.testing.assert_allclose(np.asarray(total_loss2), np.asarray(ref2), rtol=1e-5, atol=1e-5)
    print("KERNEL_OK")
</pallas_src>

<mosaic_0001>
module attributes {stable_mosaic.version = 11 : i64} {
  func.func @_cls_loss_kernel(%arg0: i32, %arg1: memref<8x32xf32, #tpu.memory_space<vmem>>, %arg2: memref<8x32xf32, #tpu.memory_space<vmem>>, %arg3: memref<1x32xf32, #tpu.memory_space<vmem>>, %arg4: memref<1xf32, #tpu.memory_space<smem>>, %arg5: memref<8x32xf32, #tpu.memory_space<vmem>>, %arg6: memref<8x32xf32, #tpu.memory_space<vmem>>, %arg7: memref<8x1xf32, #tpu.memory_space<vmem>>) attributes {dimension_semantics = [#tpu.dimension_semantics<arbitrary>], iteration_bounds = array<i64: 2>, scalar_prefetch = 0 : i64, scratch_operands = 3 : i64, tpu.core_type = #tpu.core_type<tc>, window_params = [{transform_indices = @transform_0, window_bounds = array<i64: 8, 32>}, {transform_indices = @transform_1, window_bounds = array<i64: 8, 32>}, {pipeline_mode = #tpu.pipeline_mode<synchronous>, transform_indices = @transform_2, window_bounds = array<i64: 1, 32>}, {transform_indices = @transform_3, window_bounds = array<i64: 1>}]} {
    %c0_i32 = arith.constant 0 : i32
    %0 = arith.cmpi eq, %arg0, %c0_i32 : i32
    %1 = arith.extui %0 : i1 to i32
    %c0_i32_0 = arith.constant 0 : i32
    %2 = arith.cmpi ne, %1, %c0_i32_0 : i32
    scf.if %2 {
      %cst_25 = arith.constant 0.000000e+00 : f32
      %47 = vector.broadcast %cst_25 : f32 to vector<8x32xf32>
      %c0_26 = arith.constant 0 : index
      %c0_27 = arith.constant 0 : index
      %48 = vector.load %arg5[%c0_26, %c0_27] : memref<8x32xf32, #tpu.memory_space<vmem>>, vector<8x32xf32>
      tpu.vector_store %arg5[%c0_26, %c0_27], %47 {strides = array<i32>} : memref<8x32xf32, #tpu.memory_space<vmem>>, vector<8x32xf32>,
      %cst_28 = arith.constant 0.000000e+00 : f32
      %49 = vector.broadcast %cst_28 : f32 to vector<8x32xf32>
      %c0_29 = arith.constant 0 : index
      %c0_30 = arith.constant 0 : index
      %50 = vector.load %arg6[%c0_29, %c0_30] : memref<8x32xf32, #tpu.memory_space<vmem>>, vector<8x32xf32>
      tpu.vector_store %arg6[%c0_29, %c0_30], %49 {strides = array<i32>} : memref<8x32xf32, #tpu.memory_space<vmem>>, vector<8x32xf32>,
      %cst_31 = arith.constant 0.000000e+00 : f32
      %51 = vector.broadcast %cst_31 : f32 to vector<8x1xf32>
      %c0_32 = arith.constant 0 : index
      %c0_33 = arith.constant 0 : index
      %52 = vector.load %arg7[%c0_32, %c0_33] : memref<8x1xf32, #tpu.memory_space<vmem>>, vector<8x1xf32>
      tpu.vector_store %arg7[%c0_32, %c0_33], %51 {strides = array<i32>} : memref<8x1xf32, #tpu.memory_space<vmem>>, vector<8x1xf32>,
    } else {
    }
    %c0 = arith.constant 0 : index
    %c0_1 = arith.constant 0 : index
    %3 = vector.load %arg1[%c0, %c0_1] : memref<8x32xf32, #tpu.memory_space<vmem>>, vector<8x32xf32>
    %c0_2 = arith.constant 0 : index
    %c0_3 = arith.constant 0 : index
    %4 = vector.load %arg3[%c0_2, %c0_3] : memref<1x32xf32, #tpu.memory_space<vmem>>, vector<1x32xf32>
    %5 = vector.broadcast %4 : vector<1x32xf32> to vector<8x32xf32>
    %6 = arith.subf %3, %5 : vector<8x32xf32>
    %cst = arith.constant 1.600000e+01 : f32
    %7 = vector.broadcast %cst : f32 to vector<8x32xf32>
    %8 = arith.mulf %6, %7 : vector<8x32xf32>
    %cst_4 = arith.constant dense<0xFF800000> : vector<8xf32>
    %9 = vector.multi_reduction <maximumf>, %8, %cst_4 [1] : vector<8x32xf32> to vector<8xf32>
    %10 = vector.shape_cast %9 : vector<8xf32> to vector<8x1xf32>
    %11 = vector.broadcast %10 : vector<8x1xf32> to vector<8x32xf32>
    %12 = arith.subf %8, %11 : vector<8x32xf32>
    %13 = math.exp %12 : vector<8x32xf32>
    %cst_5 = arith.constant dense<0.000000e+00> : vector<8xf32>
    %14 = vector.multi_reduction <add>, %13, %cst_5 [1] : vector<8x32xf32> to vector<8xf32>
    %15 = vector.shape_cast %14 : vector<8xf32> to vector<8x1xf32>
    %16 = tpu.reciprocal %15 : vector<8x1xf32> -> vector<8x1xf32>
    %17 = vector.broadcast %16 : vector<8x1xf32> to vector<8x32xf32>
    %18 = arith.mulf %13, %17 : vector<8x32xf32>
    %c0_6 = arith.constant 0 : index
    %c0_7 = arith.constant 0 : index
    %19 = vector.load %arg2[%c0_6, %c0_7] : memref<8x32xf32, #tpu.memory_space<vmem>>, vector<8x32xf32>
    %cst_8 = arith.constant 1.000000e+01 : f32
    %20 = vector.broadcast %cst_8 : f32 to vector<8x32xf32>
    %21 = arith.mulf %19, %20 : vector<8x32xf32>
    %cst_9 = arith.constant dense<0xFF800000> : vector<8xf32>
    %22 = vector.multi_reduction <maximumf>, %21, %cst_9 [1] : vector<8x32xf32> to vector<8xf32>
    %23 = vector.shape_cast %22 : vector<8xf32> to vector<8x1xf32>
    %24 = vector.broadcast %23 : vector<8x1xf32> to vector<8x32xf32>
    %25 = arith.subf %21, %24 : vector<8x32xf32>
    %26 = math.exp %25 : vector<8x32xf32>
    %cst_10 = arith.constant dense<0.000000e+00> : vector<8xf32>
    %27 = vector.multi_reduction <add>, %26, %cst_10 [1] : vector<8x32xf32> to vector<8xf32>
    %28 = vector.shape_cast %27 : vector<8xf32> to vector<8x1xf32>
    %29 = math.log %28 : vector<8x1xf32>
    %30 = vector.broadcast %29 : vector<8x1xf32> to vector<8x32xf32>
    %31 = arith.subf %25, %30 : vector<8x32xf32>
    %c0_11 = arith.constant 0 : index
    %c0_12 = arith.constant 0 : index
    %32 = vector.load %arg5[%c0_11, %c0_12] : memref<8x32xf32, #tpu.memory_space<vmem>>, vector<8x32xf32>
    %33 = arith.addf %32, %18 : vector<8x32xf32>
    %c0_13 = arith.constant 0 : index
    %c0_14 = arith.constant 0 : index
    %34 = vector.load %arg5[%c0_13, %c0_14] : memref<8x32xf32, #tpu.memory_space<vmem>>, vector<8x32xf32>
    tpu.vector_store %arg5[%c0_13, %c0_14], %33 {strides = array<i32>} : memref<8x32xf32, #tpu.memory_space<vmem>>, vector<8x32xf32>,
    %c0_15 = arith.constant 0 : index
    %c0_16 = arith.constant 0 : index
    %35 = vector.load %arg6[%c0_15, %c0_16] : memref<8x32xf32, #tpu.memory_space<vmem>>, vector<8x32xf32>
    %36 = arith.addf %35, %31 : vector<8x32xf32>
    %c0_17 = arith.constant 0 : index
    %c0_18 = arith.constant 0 : index
    %37 = vector.load %arg6[%c0_17, %c0_18] : memref<8x32xf32, #tpu.memory_space<vmem>>, vector<8x32xf32>
    tpu.vector_store %arg6[%c0_17, %c0_18], %36 {strides = array<i32>} : memref<8x32xf32, #tpu.memory_space<vmem>>, vector<8x32xf32>,
    %c0_19 = arith.constant 0 : index
    %c0_20 = arith.constant 0 : index
    %38 = vector.load %arg7[%c0_19, %c0_20] : memref<8x1xf32, #tpu.memory_space<vmem>>, vector<8x1xf32>
    %39 = arith.mulf %18, %31 : vector<8x32xf32>
    %cst_21 = arith.constant dense<0.000000e+00> : vector<8xf32>
    %40 = vector.multi_reduction <add>, %39, %cst_21 [1] : vector<8x32xf32> to vector<8xf32>
    %41 = vector.shape_cast %40 : vector<8xf32> to vector<8x1xf32>
    %42 = arith.addf %38, %41 : vector<8x1xf32>
    %c0_22 = arith.constant 0 : index
    %c0_23 = arith.constant 0 : index
    %43 = vector.load %arg7[%c0_22, %c0_23] : memref<8x1xf32, #tpu.memory_space<vmem>>, vector<8x1xf32>
    tpu.vector_store %arg7[%c0_22, %c0_23], %42 {strides = array<i32>} : memref<8x1xf32, #tpu.memory_space<vmem>>, vector<8x1xf32>,
    %c1_i32 = arith.constant 1 : i32
    %44 = arith.cmpi eq, %arg0, %c1_i32 : i32
    %45 = arith.extui %44 : i1 to i32
    %c0_i32_24 = arith.constant 0 : i32
    %46 = arith.cmpi ne, %45, %c0_i32_24 : i32
    scf.if %46 {
      %c0_25 = arith.constant 0 : index
      %c0_26 = arith.constant 0 : index
      %47 = vector.load %arg5[%c0_25, %c0_26] : memref<8x32xf32, #tpu.memory_space<vmem>>, vector<8x32xf32>
      %c0_27 = arith.constant 0 : index
      %c0_28 = arith.constant 0 : index
      %48 = vector.load %arg6[%c0_27, %c0_28] : memref<8x32xf32, #tpu.memory_space<vmem>>, vector<8x32xf32>
      %49 = arith.mulf %47, %48 : vector<8x32xf32>
      %50 = vector.shape_cast %49 : vector<8x32xf32> to vector<1x8x32xf32>
      %cst_29 = arith.constant dense<0.000000e+00> : vector<1xf32>
      %51 = vector.multi_reduction <add>, %50, %cst_29 [1, 2] : vector<1x8x32xf32> to vector<1xf32>
      %52 = vector.shape_cast %51 : vector<1xf32> to vector<1x1x1xf32>
      %53 = vector.extract %52[0, 0, 0] : f32 from vector<1x1x1xf32>
      %c0_30 = arith.constant 0 : index
      %c0_31 = arith.constant 0 : index
      %54 = vector.load %arg7[%c0_30, %c0_31] : memref<8x1xf32, #tpu.memory_space<vmem>>, vector<8x1xf32>
      %55 = vector.shape_cast %54 : vector<8x1xf32> to vector<1x8x1xf32>
      %cst_32 = arith.constant dense<0.000000e+00> : vector<1xf32>
      %56 = vector.multi_reduction <add>, %55, %cst_32 [1, 2] : vector<1x8x1xf32> to vector<1xf32>
      %57 = vector.shape_cast %56 : vector<1xf32> to vector<1x1x1xf32>
      %58 = vector.extract %57[0, 0, 0] : f32 from vector<1x1x1xf32>
      %59 = arith.subf %58, %53 : f32
      %cst_33 = arith.constant 1.250000e-01 : f32
      %60 = arith.mulf %59, %cst_33 : f32
      %c0_34 = arith.constant 0 : index
      %61 = memref.load %arg4[%c0_34] : memref<1xf32, #tpu.memory_space<smem>>
      memref.store %60, %arg4[%c0_34] : memref<1xf32, #tpu.memory_space<smem>>
    } else {
    }
    return
  }
  func.func @transform_0(%arg0: i32) -> (i32, i32) {
    %c0_i32 = arith.constant 0 : i32
    %c0_i32_0 = arith.constant 0 : i32
    return %arg0, %c0_i32 : i32, i32
  }
  func.func @transform_1(%arg0: i32) -> (i32, i32) {
    %c0_i32 = arith.constant 0 : i32
    %c0_i32_0 = arith.constant 0 : i32
    return %arg0, %c0_i32 : i32, i32
  }
  func.func @transform_2(%arg0: i32) -> (i32, i32) {
    %c0_i32 = arith.constant 0 : i32
    %c0_i32_0 = arith.constant 0 : i32
    %c0_i32_1 = arith.constant 0 : i32
    return %c0_i32, %c0_i32_0 : i32, i32
  }
  func.func @transform_3(%arg0: i32) -> i32 {
    %c0_i32 = arith.constant 0 : i32
    %c0_i32_0 = arith.constant 0 : i32
    return %c0_i32 : i32
  }
}

</mosaic_0001>

<bundles_post_ra>
// kernel: tpu_custom_call.1
= control target key start
LH: loop header
LB: loop body
LE: loop exit
PB: predicated region body
PF: predicated region fallthrough
CT: control target
= control target key end

     0   :  { %8 = vsyncpa [#allocation6], 0  ;;  %s777_s0 = inlined_call_operand.hbm [shape: f32[16,32], index: 0, kind: input, shape index: {}]   ;;  %s778_s1 = inlined_call_operand.hbm [shape: f32[16,32], index: 1, kind: input, shape index: {}]   ;;  %s779_s2 = inlined_call_operand.vmem [shape: f32[1,32], index: 2, kind: input, shape index: {}]   ;;  %s780_s3 = inlined_call_operand.hbm [shape: f32[1], index: 3, kind: output, shape index: {}]  }
   0x1   :  { %10 = vsyncpa [#allocation6 + $0x1], 0 }
   0x2   :  { %11 = vsyncpa [#allocation9], 0 }
   0x3   :  { %13 = vsyncpa [#allocation9 + $0x1], 0 }
   0x4   :  { %14 = vsyncpa [#allocation7], 0  ;;  %s602_s12 = smov 0   ;;  %s604_s13 = smov 0  }
   0x5   :  { %s606_s14 = smov 0   ;;  %s608_s15 = smov 0  }
   0x6 LB: > { %s621_s16 = sadd.s32 4294967295, %s576_s15   ;;  %s624_s17 = sadd.s32 1, %s576_s15   ;;  %s576_s15 = sphi %s608_s15, %s792_s15   ;;  %s572_s14 = sphi %s606_s14, %s791_s14   ;;  %s568_s13 = sphi %s604_s13, %s790_s13   ;;  %s564_s12 = sphi %s602_s12, %s789_s12  }
   0x7   : > { %s24_s18 = ssub.s32 %s576_s15, %s624_s17  ;;  %s27_s19 = sadd.s32 1, %s572_s14 }
   0x8   : > { %p25_p0 = scmp.eq.s32.totalorder %s24_s18, 0  ;;  %p34_p1 = scmp.ne.s32.totalorder %s572_s14, %s568_s13 }
   0x9   : > { %p35_p2 = scmp.eq.s32.totalorder %s576_s15, 0  ;;  %p40_p3 = scmp.ne.s32.totalorder %s568_s13, %s564_s12 }
   0xa   : > { %s634_s20 = scalar_select %p25_p0, %s572_s14, %s27_s19  }
   0xb   : > { %p36_p4 = por %p35_p2, %p34_p1  ;;  %p41_p5 = scmp.eq.s32.totalorder %s621_s16, 0 }
   0xc   : > { %p417_p6 = scmp.lt.s32.totalorder %s576_s15, 2  ;;  %s643_s22 = sand.u32 1, %s572_s14  }
   0xd   : > { %p638_p7 = por %p41_p5, %p40_p3  ;;  %s384_s23 = sshll.u32 %s643_s22, 3 }
   0xe   : > { %s385_s24 = sshll.u32 %s576_s15, 7  ;;  %s139_s28 = scalar_lea.vmem [#allocation5], %s384_s23 }
   0xf   : > { %s782_s21 = scalar_select %p638_p7, 1, 0 }
  0x10   : > { %s652_s27 = scalar_lea.hbm %s777_s0, %s385_s24  ;;  %s146_s29 = sshll.u32 %s139_s28, 4  ;;  %s656_s29 = int_to_ptr.vmem [resolvable:$true] %s146_s29 }
  0x11   : > { %p658_p8 = pnand %p417_p6, %p36_p4  ;;  %s136_s4 = scalar_lea.sflag [#allocation6], %s643_s22 }
  0x12   : > { %s462_s5 = scalar_lea.hbm %s652_s27, 128  ;;  %s467_s8 = scalar_lea.hbm %s777_s0, 256 }
  0x13   : > { %p463_p11 = scmp.ne.s32.totalorder %s652_s27, %s462_s5  ;;  %p464_p12 = pneg %p658_p8 }
  0x14   : > { %p468_p1 = scmp.lt.u32.totalorder %s652_s27, %s777_s0  ;;  %p469_p2 = scmp.lt.u32.totalorder %s467_s8, %s462_s5 }
  0x15   : > { %p465_p13 = pnand %p464_p12, %p463_p11  ;;  %p471_p4 = scmp.lt.u32.totalorder %s462_s5, %s652_s27 }
  0x16   : > { %p470_p3 = por %p469_p2, %p468_p1 }
  0x17   : > { %p466_p0 = pneg %p465_p13 }
  0x18   : > { %p472_p5 = por %p471_p4, %p470_p3 }
  0x1a   : > { %p473_p6 = pnand %p472_p5, %p466_p0 }
  0x1c   : > { %476 = shalt.err (!%p473_p6)
}
  0x1d   : > { %s477_s11 = scalar_lea.vmem %s656_s29, 128  ;;  %s578_s12 = smov [#allocation5]  }
  0x1e   : > { %p478_p11 = scmp.ne.s32.totalorder %s656_s29, %s477_s11  ;;  %s482_s18 = sshll.u32 %s578_s12, 4  ;;  %s483_s18 = int_to_ptr.vmem [resolvable:$false] %s482_s18 }
  0x1f   : > { %s484_s19 = scalar_lea.vmem %s483_s18, 256  ;;  %p485_p10 = scmp.lt.s32.totalorder %s656_s29, %s483_s18 }
  0x20   : > { %p480_p13 = pnand %p478_p11, %p464_p12  ;;  %p486_p1 = scmp.lt.s32.totalorder %s484_s19, %s477_s11 }
  0x22   : > { %p481_p9 = pneg %p480_p13  ;;  %p487_p2 = por %p486_p1, %p485_p10 }
  0x24   : > { %p488_p3 = pnand %p487_p2, %p481_p9 }
  0x26   : > { %491 = shalt.err (!%p488_p3)
}
  0x27   : > { %413 = dma.hbm_to_vmem [thread:$0]  (!%p658_p8), %s652_s27, 128, %s656_s29, %s136_s4  }
  0x28   : > { %p784_p0 = scmp.lt.s32.totalorder %s576_s15, 3  ;;  %p785_p4 = scmp.ge.s32.totalorder %s576_s15, 1 }
  0x29   : > { %s703_s5 = scalar_lea.hbm %s778_s1, %s385_s24  ;;  %s157_s6 = scalar_lea.vmem [#allocation8], %s384_s23 }
  0x2a   : > { %p694_p5 = pnand %p785_p4, %p784_p0  ;;  %s164_s7 = sshll.u32 %s157_s6, 4  ;;  %s165_s7 = int_to_ptr.vmem [resolvable:$true] %s164_s7 }
  0x2b   : > { %s154_s27 = scalar_lea.sflag [#allocation9], %s643_s22  ;;  %s492_s29 = scalar_lea.hbm %s703_s5, 128 }
  0x2c   : > { %s786_s25 = scalar_select %p694_p5, 1, 0 }
  0x2d   : > { %p493_p9 = scmp.ne.s32.totalorder %s703_s5, %s492_s29  ;;  %s497_s24 = scalar_lea.hbm %s778_s1, 256 }
  0x2e   : > { %p498_p11 = scmp.lt.u32.totalorder %s703_s5, %s778_s1  ;;  %p499_p13 = scmp.lt.u32.totalorder %s497_s24, %s492_s29 }
  0x2f   : > { %p495_p10 = pnand %p493_p9, %p464_p12  ;;  %p501_p2 = scmp.lt.u32.totalorder %s492_s29, %s703_s5 }
  0x30   : > { %p500_p1 = por %p499_p13, %p498_p11 }
  0x31   : > { %p496_p6 = pneg %p495_p10 }
  0x32   : > { %p502_p3 = por %p501_p2, %p500_p1 }
  0x34   : > { %p503_p0 = pnand %p502_p3, %p496_p6 }
  0x36   : > { %506 = shalt.err (!%p503_p0)
}
  0x37   : > { %s507_s22 = scalar_lea.vmem %s165_s7, 128  ;;  %s579_s23 = smov [#allocation8]  }
  0x38   : > { %p508_p4 = scmp.ne.s32.totalorder %s165_s7, %s507_s22  ;;  %s512_s10 = sshll.u32 %s579_s23, 4  ;;  %s513_s10 = int_to_ptr.vmem [resolvable:$false] %s512_s10 }
  0x39   : > { %s514_s11 = scalar_lea.vmem %s513_s10, 256  ;;  %p515_p7 = scmp.lt.s32.totalorder %s165_s7, %s513_s10 }
  0x3a   : > { %p510_p9 = pnand %p508_p4, %p464_p12  ;;  %p516_p5 = scmp.lt.s32.totalorder %s514_s11, %s507_s22 }
  0x3c   : > { %p511_p10 = pneg %p510_p9  ;;  %p517_p11 = por %p516_p5, %p515_p7 }
  0x3e   : > { %p518_p13 = pnand %p517_p11, %p511_p10 }
  0x40   : > { %521 = shalt.err (!%p518_p13)
}
  0x41   : > { %416 = dma.hbm_to_vmem [thread:$0]  (!%p658_p8), %s703_s5, 128, %s165_s7, %s154_s27  }
  0x42   : > { %p787_p6 = scmp.ne.s32.totalorder %s786_s25, 0 }
  0x43   : > { %s175_s12 = sand.u32 (!%p787_p6), 1, %s568_s13   ;;  %p788_p12 = scmp.ne.s32.totalorder (!%p787_p6), %s782_s21, 0 }
  0x44   : > { %173 = sbr.rel (%p787_p6) target bundleno = 788 (0x314), region = 32  ;;  %s389_s18 = sshll.u32 (!%p787_p6), %s175_s12, 3 }
  0x45   : > { %s176_s19 = scalar_lea.sflag (!%p787_p6), [#allocation6], %s175_s12  ;;  %s179_s26 = scalar_lea.vmem (!%p787_p6), [#allocation5], %s389_s18 }
  0x4b   : > { %551 = dma.done.wait (%p788_p12), %s176_s19, 128  }
  0x4c   : > { %553 = vsyncadd (%p788_p12), %s176_s19, 4294967168  ;;  %s185_s28 = scalar_lea.sflag [#allocation9], %s175_s12  ;;  %s188_s6 = scalar_lea.vmem [#allocation8], %s389_s18 }
  0x4d   : > { %555 = dma.done.wait (%p788_p12), %s185_s28, 128  }
  0x4e   : > { %557 = vsyncadd (%p788_p12), %s185_s28, 4294967168  ;;  %p391_p7 = scmp.ne.s32.totalorder %s621_s16, 0 }
  0x4f   : > { %vm215_vm0 = vcmask (!%p391_p7), 261120   ;;  %vm218_vm1 = vcmask (!%p391_p7), 7168   ;;  %v580_v0 = vmov (!%p391_p7), 0.0  }
  0x50   : > { %214 = sbr.rel (%p391_p7) target bundleno = 87 (0x57), region = 44  ;;  %216 = vst.msk [vmem:[#allocation2] sm:$0xff] (!%p391_p7), %vm215_vm0, %v580_v0  ;;  %217 = vst.msk [vmem:[#allocation3] sm:$0xff] (!%p391_p7), %vm215_vm0, %v580_v0 }
  0x51   : > { %219 = vst.msk [vmem:[#allocation4] sm:$0xff] (!%p391_p7), %vm218_vm1, %v580_v0 }
  0x57 PF: > { %vm230_vm2 = vcmask 261120   ;;  %v242_v1 = vld [vmem:[%s188_s6] sm:$0xff]  ;;  %v220_v2 = vld [vmem:[%s179_s26] sm:$0xff]  ;;  %vm268_vm3 = vcmask 7168   ;;  %p393_p8 = scmp.ne.s32.totalorder %s621_s16, 1 }
  0x58   : > { %v392_v3 = vld [vmem:[%s779_s2] ss:$0 sm:$0xff]  ;;  %v243_v4 = vmul.f32 10.0, %v242_v1  ;;  %v259_v23 = vld [vmem:[#allocation3] sm:$0xff]  ;;  %v262_v32 = vld [vmem:[#allocation4] sm:$0xff] }
  0x59   : > { %v228_v5 = vsub.f32 %v220_v2, %v392_v3  ;;  %v256_v26 = vld [vmem:[#allocation2] sm:$0xff] }
  0x5a   : > { %v244_v6 = vsel %vm230_vm2, %v243_v4, -inf }
  0x5b   : > { %v229_v7 = vmul.f32 16.0, %v228_v5  ;;  %245 = vmax.xlane.f32.xlu0 %v244_v6 }
  0x5d   : > { %v231_v8 = vsel %vm230_vm2, %v229_v7, -inf }
  0x5f   : > { %232 = vmax.xlane.f32.xlu0 %v231_v8 }
  0xe8   : > { %v246_v9 = vpop.xlane.xlu0 %245 }
  0xe9   : > { %v247_v10 = vsub.f32 %v243_v4, %v246_v9 }
  0xeb   : > { %v248_v11 = vmul.f32 1.442695, %v247_v10 }
  0xec   : > { %v233_v12 = vpop.xlane.xlu0 %232 }
  0xed   : > { %454 = vpow2.f32 %v248_v11  ;;  %v234_v13 = vsub.f32 %v229_v7, %v233_v12 }
  0xef   : > { %v235_v14 = vmul.f32 1.442695, %v234_v13 }
  0xf1   : > { %456 = vpow2.f32 %v235_v14 }
  0xf7   : > { %v455_v15 = vpop.eup %454 }
  0xf8   : > { %v250_v16 = vsel %vm230_vm2, %v455_v15, 0.0 }
  0xf9   : > { %251 = vadd.xlane.f32.xlu1 %v250_v16 }
  0xfb   : > { %v457_v17 = vpop.eup %456 }
  0xfc   : > { %v237_v18 = vsel %vm230_vm2, %v457_v17, 0.0 }
  0xfd   : > { %238 = vadd.xlane.f32.xlu1 %v237_v18 }
 0x186   : > { %v252_v19 = vpop.xlane.xlu1 %251 }
 0x187   : > { %458 = vlog2.f32 %v252_v19 }
 0x18a   : > { %v239_v20 = vpop.xlane.xlu1 %238 }
 0x18b   : > { %460 = vrcp.f32 %v239_v20 }
 0x191   : > { %v459_v21 = vpop.eup %458 }
 0x192   : > { %v254_v22 = vmul.f32 0.6931472, %v459_v21 }
 0x194   : > { %v255_v24 = vsub.f32 %v247_v10, %v254_v22 }
 0x195   : > { %v461_v25 = vpop.eup %460 }
 0x196   : > { %v241_v27 = vmul.f32 %v461_v25, %v457_v17  ;;  %v260_v28 = vadd.f32 %v259_v23, %v255_v24 }
 0x198   : > { %261 = vst.msk [vmem:[#allocation3] sm:$0xff] %vm230_vm2, %v260_v28  ;;  %v263_v29 = vmul.f32 %v255_v24, %v241_v27  ;;  %v257_v30 = vadd.f32 %v256_v26, %v241_v27 }
 0x19a   : > { %v264_v31 = vsel %vm230_vm2, %v263_v29, 0.0  ;;  %258 = vst.msk [vmem:[#allocation2] sm:$0xff] %vm230_vm2, %v257_v30 }
 0x19b   : > { %265 = vadd.xlane.f32.xlu0 %v264_v31 }
 0x19f   : > { %v275_v36 = vld [vmem:[#allocation3] sm:$0xff] (!%p393_p8) }
 0x1a1   : > { %v274_v35 = vld [vmem:[#allocation2] sm:$0xff] (!%p393_p8) }
 0x1a2   : > { %v276_v37 = vmul.f32 (!%p393_p8), %v275_v36, %v274_v35 }
 0x1a4   : > { %v277_v39 = vsel (!%p393_p8), %vm230_vm2, %v276_v37, 0.0 }
 0x1a5   : > { %278 = vadd.xlane.f32.xlu0 (!%p393_p8), %v277_v39 }
 0x225   : > { %273 = sbr.rel (%p393_p8) target bundleno = 773 (0x305), region = 48 }
 0x228   : > { %v266_v33 = vpop.xlane.xlu0 %265 }
 0x229   : > { %v267_v34 = vadd.f32 %v266_v33, %v262_v32 }
 0x22b   : > { %269 = vst.msk [vmem:[#allocation4] sm:$0xff] %vm268_vm3, %v267_v34 }
 0x232   : > { %v287_v38 = vld [vmem:[#allocation4] sm:$0xff]  ;;  %v279_v41 = vpop.xlane.xlu0 %278 }
 0x233   : > { %v288_v40 = vsel %vm268_vm3, %v287_v38, 0.0  ;;  %v280_v42 = vrot.slane %v279_v41, 4 }
 0x234   : > { %289 = vadd.xlane.f32.xlu0 %v288_v40 }
 0x235   : > { %v281_v43 = vadd.f32 %v280_v42, %v279_v41 }
 0x237   : > { %v282_v45 = vrot.slane %v281_v43, 2 }
 0x239   : > { %v283_v48 = vadd.f32 %v282_v45, %v281_v43 }
 0x23b   : > { %v284_v50 = vrot.slane %v283_v48, 1 }
 0x23d   : > { %v285_v52 = vadd.f32 %v284_v50, %v283_v48 }
 0x23f   : > { %398 = vpush %v285_v52 }
 0x270   : > { %s399_s21 = spop %398 }
 0x2c1   : > { %v290_v44 = vpop.xlane.xlu0 %289 }
 0x2c2   : > { %v291_v46 = vrot.slane %v290_v44, 4 }
 0x2c4   : > { %v292_v47 = vadd.f32 %v291_v46, %v290_v44 }
 0x2c6   : > { %v293_v49 = vrot.slane %v292_v47, 2 }
 0x2c8   : > { %v294_v51 = vadd.f32 %v293_v49, %v292_v47 }
 0x2ca   : > { %v295_v53 = vrot.slane %v294_v51, 1 }
 0x2cc   : > { %v296_v54 = vadd.f32 %v295_v53, %v294_v51 }
 0x2ce   : > { %400 = vpush %v296_v54 }
 0x2ff   : > { %s401_s5 = spop %400 }
 0x300   : > { %s298_s7 = ssub.f32 %s401_s5, %s399_s21 }
 0x302   : > { %s299_s27 = smul.f32 0.125, %s298_s7 }
 0x304   : > { %301 = sst [smem:[#allocation10]] %s299_s27 }
 0x305 PF: > { %p418_p5 = scmp.eq.s32.totalorder %s621_s16, 1  ;;  %s522_s4 = scalar_lea.hbm %s780_s3, 16 }
 0x306   : > { %p523_p1 = scmp.ne.s32.totalorder %s780_s3, %s522_s4  ;;  %p528_p0 = scmp.lt.u32.totalorder %s522_s4, %s780_s3 }
 0x308   : > { %p524_p2 = pnand %p523_p1, %p418_p5 }
 0x30a   : > { %p525_p3 = pneg %p524_p2 }
 0x30c   : > { %p530_p4 = pnand %p528_p0, %p525_p3 }
 0x30e   : > { %533 = shalt.err (!%p530_p4)
}
 0x30f   : > { %s581_s23 = smov [#allocation10]  }
 0x310   : > { %407 = dma.smem_to_hbm (%p418_p5), %s581_s23, 16, %s780_s3, [#allocation7]  }
 0x311   : > { %559 = dma.done.wait (%p418_p5), [#allocation7], 16  }
 0x312   : > { %561 = vsyncadd (%p418_p5), [#allocation7], 4294967280 }
 0x313   : > { %315 = sfence }
 0x314 PF: > { %p17_p9 = scmp.ge.s32.totalorder %s624_s17, 4   ;;  %s789_s12 = smov %s568_s13 }
 0x315   : > { %s790_s13 = smov %s572_s14  ;;  %s791_s14 = smov %s634_s20 }
 0x316   : > { %s792_s15 = smov %s624_s17  ;;  %19 = sbr.rel (!%p17_p9) target bundleno = 6 (0x6), region = 91 }
 0x31d   :  { %321 = vsyncpa [#allocation6], 1 }
 0x31e   :  { %323 = vsyncpa [#allocation6 + $0x1], 1 }
 0x31f   :  { %324 = vsyncpa [#allocation9], 1 }
 0x320   :  { %326 = vsyncpa [#allocation9 + $0x1], 1 }
 0x321   :  { %327 = vsyncpa [#allocation7], 1 }
 0x322   :  { %329 = vsyncpa [#allocation7 + $0x1], 1 }

</bundles_post_ra>
